<compile_context>
chip_gen: v7x
topology: tpu7x:2x2x1
jax: 0.10.0
libtpu: 0.0.40
codegen_flags: <defaults>
</compile_context>

<pallas_src>
import math

import jax
import jax.numpy as jnp
from jax import lax
from jax.experimental import pallas as pl
from jax.experimental.pallas import tpu as pltpu

_LN10000 = math.log(10000.0)
_HALF_PI = math.pi / 2.0
_UNROLL_BATCH_MAX = 32          # static slab unroll limit; larger B uses a fori_loop


class Functional:
    """JAX analogue of sbrl's torch `Functional` module: forward(x, **kw) == func(x, **kw)."""

    def __init__(self, func):
        assert callable(func), "Requires a callable function as input"
        self.func = func

    def __call__(self, x, **kwargs):
        return self.func(x, **kwargs)


def _make_pe_add_kernel(d_model: int, batch: int):
    """Kernel over the lane-dense [S, B*D] view.

    Per grid step:
      x_ref     : (tile_s, B*D)  tile of x
      invf_ref  : (1, D) f32     exp(-ln(1e4)/D * 2*(k//2))   (hoisted, constant index_map)
      phase_ref : (1, D) f32     (k % 2) * pi/2                (hoisted, constant index_map)
    The sinusoid is evaluated once per (position, feature) -- a (tile_s, D) sub-tile -- so the
    transcendental/index work is 1/B of the per-element version; the add streams at HBM rate.
    """

    def kernel(x_ref, invf_ref, phase_ref, o_ref):
        tile_s = x_ref.shape[0]
        base = pl.program_id(0) * tile_s
        pos = (base + lax.broadcasted_iota(jnp.int32, (tile_s, 1), 0)).astype(jnp.float32)
        # cos(a) == sin(a + pi/2): single transcendental; exp / %2 / //2 hoisted to the wrapper.
        angle = pos * invf_ref[...] + phase_ref[...]            # (tile_s, D) f32
        pe = jnp.sin(angle).astype(o_ref.dtype)                 # cast once; add in x's dtype

        if batch <= _UNROLL_BATCH_MAX:
            for b in range(batch):                              # static slabs (lane-aligned if D%128==0)
                c0 = b * d_model
                o_ref[:, c0:c0 + d_model] = x_ref[:, c0:c0 + d_model] + pe
        else:
            def body(b, carry):
                c0 = b * d_model
                if d_model % 128 == 0:
                    c0 = pl.multiple_of(c0, 128)
                o_ref[:, pl.ds(c0, d_model)] = x_ref[:, pl.ds(c0, d_model)] + pe
                return carry
            lax.fori_loop(0, batch, body, 0)

    return kernel


def _choose_tile_s(S: int, row_bytes: int, target_bytes: int) -> int:
    """Sequence rows per block: full extent when small, else a multiple of 8 sized to the VMEM
    budget, preferring >= ~4 grid steps (v7x: 2 TCs x >= 2 steps each) and a divisor of S when
    one exists (no ragged tail block)."""
    full_ok = S * row_bytes <= target_bytes
    if full_ok and (S <= 32 or S * row_bytes <= (1 << 20)):
        return S
    by_budget = max(8, (target_bytes // max(row_bytes, 1)) // 8 * 8)
    by_split = max(8, (S // 4) // 8 * 8)
    cap = max(8, min(by_budget, by_split))
    t = cap
    for _ in range(64):          # bounded search for a multiple of 8 that divides S
        if t < 8:
            break
        if S % t == 0:
            return t
        t -= 8
    return cap


def positional_encoding(x: jax.Array, *, tile_bytes: int = 4 * 1024 * 1024) -> jax.Array:
    """x: [S, B, D]. Returns x + pe[:S] broadcast over the batch axis (eval-mode dropout)."""
    S, B, D = x.shape
    assert D % 2 == 0, "sinusoidal PE requires an even embedding dim"
    itemsize = jnp.dtype(x.dtype).itemsize

    # Hoisted, x-independent column vectors (computed once, tiny).
    k = jnp.arange(D, dtype=jnp.int32)
    inv_freq = jnp.exp((k - (k % 2)).astype(jnp.float32) * (-_LN10000 / D)).reshape(1, D)
    phase = (k % 2).astype(jnp.float32).reshape(1, D) * _HALF_PI

    # Lane-dense 2-D view (free row-major collapse): rows = positions, cols = B*D.
    view = x.reshape(S, B * D)
    C = B * D
    row_bytes = C * itemsize

    target = max(min(tile_bytes, 8 << 20), 64 << 10)
    tile_s = _choose_tile_s(S, row_bytes, target)
    grid_s = pl.cdiv(S, tile_s)        # ragged tail handled by Pallas block clipping (no pad/slice)

    lane_cols = ((C + 127) // 128) * 128
    tile_vmem = tile_s * lane_cols * itemsize
    # in + out, double-buffered, plus slack; capped below v7x's 64 MiB physical VMEM.
    vmem_limit = int(min(max(4 * tile_vmem + (4 << 20), 16 << 20), 56 << 20))

    out = pl.pallas_call(
        _make_pe_add_kernel(D, B),
        out_shape=jax.ShapeDtypeStruct((S, C), x.dtype),
        grid=(grid_s,),
        in_specs=[
            pl.BlockSpec((tile_s, C), lambda i: (i, 0)),
            pl.BlockSpec((1, D), lambda i: (0, 0)),
            pl.BlockSpec((1, D), lambda i: (0, 0)),
        ],
        out_specs=pl.BlockSpec((tile_s, C), lambda i: (i, 0)),
        input_output_aliases={0: 0},   # x += pe is an in-place update (when x is donated)
        compiler_params=pltpu.CompilerParams(
            dimension_semantics=("parallel",),
            vmem_limit_bytes=vmem_limit,
        ),
        cost_estimate=pl.CostEstimate(
            flops=2 * S * B * D + 3 * S * D,
            transcendentals=S * D,
            bytes_accessed=2 * S * B * D * itemsize + 8 * D,
        ),
    )(view, inv_freq, phase)

    return out.reshape(S, B, D)


def _reference_pos_encoding(x: jnp.ndarray) -> jnp.ndarray:
    """Pure-JAX reference mirroring the PyTorch buffer construction."""
    S, B, D = x.shape
    position = jnp.arange(S, dtype=jnp.float32)[:, None]                             # (S, 1)
    div_term = jnp.exp(jnp.arange(0, D, 2, dtype=jnp.float32) * (-_LN10000 / D))     # (D/2,)
    pe = jnp.zeros((S, D), dtype=jnp.float32)
    pe = pe.at[:, 0::2].set(jnp.sin(position * div_term))
    pe = pe.at[:, 1::2].set(jnp.cos(position * div_term))
    return x + pe[:, None, :]


if __name__ == "__main__":
    key = jax.random.PRNGKey(0)
    S, B, D = 8, 2, 32   # [sequence length, batch size, embed dim]
    x = jax.random.normal(key, (S, B, D), dtype=jnp.float32)

    # `Functional` module semantics: forward(x) == wrapped_callable(x)
    module = Functional(positional_encoding)
    out = jax.block_until_ready(module(x))

    ref = _reference_pos_encoding(x)
    assert out.shape == (S, B, D)
    assert jnp.allclose(out, ref, atol=1e-5, rtol=1e-5), "mismatch vs reference (small case)"

    # Multi-step grid with a ragged last block (clipped in-kernel, no pad/slice), lane-aligned D,
    # static batch unroll of 3.
    S2, B2, D2 = 44, 3, 128
    x2 = jax.random.normal(jax.random.PRNGKey(1), (S2, B2, D2), dtype=jnp.float32)
    out2 = jax.block_until_ready(module(x2, tile_bytes=32 * 1024))
    ref2 = _reference_pos_encoding(x2)
    assert jnp.allclose(out2, ref2, atol=1e-4, rtol=1e-4), "mismatch vs reference (ragged case)"

    # bf16 smoke test (add runs in bf16; loose tolerance for bf16 rounding).
    S3, B3, D3 = 16, 4, 128
    x3 = jax.random.normal(jax.random.PRNGKey(2), (S3, B3, D3), dtype=jnp.bfloat16)
    out3 = jax.block_until_ready(module(x3))
    ref3 = _reference_pos_encoding(x3)
    assert jnp.allclose(out3.astype(jnp.float32), ref3, atol=1e-1), "mismatch vs reference (bf16)"

    print("KERNEL_OK")
</pallas_src>

<mosaic_0001>
module attributes {stable_mosaic.version = 11 : i64} {
  func.func @kernel(%arg0: i32, %arg1: memref<8x64xf32, #tpu.memory_space<vmem>>, %arg2: memref<1x32xf32, #tpu.memory_space<vmem>>, %arg3: memref<1x32xf32, #tpu.memory_space<vmem>>, %arg4: memref<8x64xf32, #tpu.memory_space<vmem>>) attributes {dimension_semantics = [#tpu.dimension_semantics<parallel>], iteration_bounds = array<i64: 1>, scalar_prefetch = 0 : i64, scratch_operands = 0 : i64, tpu.core_type = #tpu.core_type<tc>, window_params = [{transform_indices = @transform_0, window_bounds = array<i64: 8, 64>}, {pipeline_mode = #tpu.pipeline_mode<synchronous>, transform_indices = @transform_1, window_bounds = array<i64: 1, 32>}, {pipeline_mode = #tpu.pipeline_mode<synchronous>, transform_indices = @transform_2, window_bounds = array<i64: 1, 32>}, {transform_indices = @transform_3, window_bounds = array<i64: 8, 64>}]} {
    %c8_i32 = arith.constant 8 : i32
    %0 = arith.muli %arg0, %c8_i32 : i32
    %1 = tpu.iota {dimensions = array<i32: 0>} : vector<8x1xi32>
    %2 = vector.broadcast %0 : i32 to vector<8x1xi32>
    %3 = arith.addi %2, %1 : vector<8x1xi32>
    %4 = arith.sitofp %3 : vector<8x1xi32> to vector<8x1xf32>
    %c0 = arith.constant 0 : index
    %c0_0 = arith.constant 0 : index
    %5 = vector.load %arg2[%c0, %c0_0] : memref<1x32xf32, #tpu.memory_space<vmem>>, vector<1x32xf32>
    %6 = vector.broadcast %4 : vector<8x1xf32> to vector<8x32xf32>
    %7 = vector.broadcast %5 : vector<1x32xf32> to vector<8x32xf32>
    %8 = arith.mulf %6, %7 : vector<8x32xf32>
    %c0_1 = arith.constant 0 : index
    %c0_2 = arith.constant 0 : index
    %9 = vector.load %arg3[%c0_1, %c0_2] : memref<1x32xf32, #tpu.memory_space<vmem>>, vector<1x32xf32>
    %10 = vector.broadcast %9 : vector<1x32xf32> to vector<8x32xf32>
    %11 = arith.addf %8, %10 : vector<8x32xf32>
    %12 = math.sin %11 : vector<8x32xf32>
    %c0_3 = arith.constant 0 : index
    %c0_4 = arith.constant 0 : index
    %13 = vector.load %arg1[%c0_3, %c0_4] : memref<8x64xf32, #tpu.memory_space<vmem>>, vector<8x32xf32>
    %14 = arith.addf %13, %12 : vector<8x32xf32>
    %c0_5 = arith.constant 0 : index
    %c0_6 = arith.constant 0 : index
    %15 = vector.load %arg4[%c0_5, %c0_6] : memref<8x64xf32, #tpu.memory_space<vmem>>, vector<8x32xf32>
    tpu.vector_store %arg4[%c0_5, %c0_6], %14 {strides = array<i32>} : memref<8x64xf32, #tpu.memory_space<vmem>>, vector<8x32xf32>,
    %c0_7 = arith.constant 0 : index
    %c32 = arith.constant 32 : index
    %16 = vector.load %arg1[%c0_7, %c32] : memref<8x64xf32, #tpu.memory_space<vmem>>, vector<8x32xf32>
    %17 = arith.addf %16, %12 : vector<8x32xf32>
    %c0_8 = arith.constant 0 : index
    %c32_9 = arith.constant 32 : index
    %18 = vector.load %arg4[%c0_8, %c32_9] : memref<8x64xf32, #tpu.memory_space<vmem>>, vector<8x32xf32>
    tpu.vector_store %arg4[%c0_8, %c32_9], %17 {strides = array<i32>} : memref<8x64xf32, #tpu.memory_space<vmem>>, vector<8x32xf32>,
    return
  }
  func.func @transform_0(%arg0: i32) -> (i32, i32) {
    %c0_i32 = arith.constant 0 : i32
    %c0_i32_0 = arith.constant 0 : i32
    return %arg0, %c0_i32 : i32, i32
  }
  func.func @transform_1(%arg0: i32) -> (i32, i32) {
    %c0_i32 = arith.constant 0 : i32
    %c0_i32_0 = arith.constant 0 : i32
    %c0_i32_1 = arith.constant 0 : i32
    return %c0_i32, %c0_i32_0 : i32, i32
  }
  func.func @transform_2(%arg0: i32) -> (i32, i32) {
    %c0_i32 = arith.constant 0 : i32
    %c0_i32_0 = arith.constant 0 : i32
    %c0_i32_1 = arith.constant 0 : i32
    return %c0_i32, %c0_i32_0 : i32, i32
  }
  func.func @transform_3(%arg0: i32) -> (i32, i32) {
    %c0_i32 = arith.constant 0 : i32
    %c0_i32_0 = arith.constant 0 : i32
    return %arg0, %c0_i32 : i32, i32
  }
}

</mosaic_0001>

<bundles_post_ra>
// kernel: tpu_custom_call.1
= control target key start
LH: loop header
LB: loop body
LE: loop exit
PB: predicated region body
PF: predicated region fallthrough
CT: control target
= control target key end

     0   :  { %8 = vsyncpa [#allocation3], 0  ;;  %s331_s0 = inlined_call_operand.hbm [shape: f32[8,64], index: 0, kind: input, shape index: {}, may-alias: {0,3}]   ;;  %s332_s1 = inlined_call_operand.vmem [shape: f32[1,32], index: 1, kind: input, shape index: {}]   ;;  %s333_s2 = inlined_call_operand.vmem [shape: f32[1,32], index: 2, kind: input, shape index: {}]   ;;  %s334_s3 = inlined_call_operand.hbm [shape: f32[8,64], index: 3, kind: output, shape index: {}, may-alias: {0,3}]  }
   0x1   :  { %9 = vsyncpa [#allocation4], 0  ;;  %s251_s12 = smov [#allocation2]   ;;  %s203_s16 = scalar_lea.hbm %s331_s0, 128 }
   0x2   :  { %s16_s13 = sshll.u32 %s251_s12, 4  ;;  %p204_p0 = scmp.ne.s32.totalorder %s331_s0, %s203_s16  ;;  %s17_s13 = int_to_ptr.vmem [resolvable:$true] %s16_s13 }
   0x3   :  { %p207_p1 = scmp.lt.u32.totalorder %s203_s16, %s331_s0 }
   0x5   :  { %p209_p2 = pnand %p207_p1, %p204_p0 }
   0x7   :  { %212 = shalt.err (!%p209_p2)
}
   0x8   :  { %s213_s21 = scalar_lea.vmem %s17_s13, 128  ;;  %p218_p4 = scmp.lt.s32.totalorder %s17_s13, %s17_s13 }
   0x9   :  { %p214_p3 = scmp.ne.s32.totalorder %s17_s13, %s213_s21  ;;  %p219_p5 = scmp.lt.s32.totalorder %s213_s21, %s213_s21 }
   0xb   :  { %p220_p6 = por %p219_p5, %p218_p4 }
   0xd   :  { %p221_p7 = pnand %p220_p6, %p214_p3 }
   0xf   :  { %224 = shalt.err (!%p221_p7)
}
  0x10   :  { %19 = dma.hbm_to_vmem [thread:$0]  %s331_s0, 128, %s17_s13, [#allocation3]  }
  0x11   :  { %247 = dma.done.wait [#allocation3], 128  }
  0x12   :  { %248 = vsyncadd [#allocation3], 4294967168  ;;  %v28_v0 = vlaneseq  ;;  %v180_v3 = vld [vmem:[%s332_s1] ss:$0 sm:$0xff]  ;;  %v252_v18 = vmov 683565275  }
  0x13   :  { %v181_v4 = vld [vmem:[%s333_s2] ss:$0 sm:$0xff]  ;;  %v253_v20 = vmov 2475754826   ;;  %v254_v22 = vmov 2131351028  }
  0x14   :  { %v29_v1 = vshrl.u32 %v28_v0, 7  ;;  %v255_v24 = vmov 2102212464   ;;  %v256_v26 = vmov 920167782   ;;  %vm155_vm13 = vcmask 261120  }
  0x15   :  { %v257_v33 = vmov 1326507024   ;;  %s258_s0 = smov 32   ;;  %s259_s1 = smov [#allocation5]   ;;  %vm163_vm14 = vcmask 523520  }
  0x16   :  { %v32_v2 = vcvt.s32.f32 %v29_v1  ;;  %s171_s2 = sshll.u32 %s259_s1, 4  ;;  %s172_s2 = int_to_ptr.vmem [resolvable:$true] %s171_s2 }
  0x17   :  { %s225_s28 = scalar_lea.vmem %s172_s2, 128  ;;  %p230_p9 = scmp.lt.s32.totalorder %s172_s2, %s172_s2 }
  0x18   :  { %v40_v5 = vmul.f32 %v180_v3, %v32_v2  ;;  %p226_p8 = scmp.ne.s32.totalorder %s172_s2, %s225_s28  ;;  %p231_p10 = scmp.lt.s32.totalorder %s225_s28, %s225_s28 }
  0x1a   :  { %v298_v6 = vadd.f32 %v181_v4, %v40_v5  ;;  %p232_p11 = por %p231_p10, %p230_p9 }
  0x1c   :  { %v52_v7 = vand.u32 2139095040, %v298_v6  ;;  %v49_v9 = vand.u32 2147483647, %v298_v6  ;;  %vm51_vm7 = vcmp.lt.s32.totalorder %v298_v6, 0  ;;  %vm141_vm12 = vweird.f32 %v298_v6  ;;  %p233_p12 = pnand %p232_p11, %p226_p8 }
  0x1e   :  { %v53_v8 = vshrl.u32 %v52_v7, 23  ;;  %v56_v12 = vand.u32 8388607, %v49_v9  ;;  %vm50_vm8 = vcmp.le.f32.partialorder %v49_v9, 0.7853982 }
  0x20   :  { %v182_v10 = vadd.s32 4294967169, %v53_v8  ;;  %v57_v15 = vor.u32 8388608, %v56_v12 }
  0x22   :  { %v59_v11 = vadd.s32 1, %v182_v10  ;;  %v97_v35 = vshll.u32 %v57_v15, 8 }
  0x24   :  { %vm60_vm0 = vcmp.gt.s32.totalorder %v59_v11, 0 }
  0x25   :  { %v61_v13 = vsel %vm60_vm0, %v59_v11, 0 }
  0x26   :  { %v63_v14 = vand.u32 31, %v61_v13  ;;  %v62_v16 = vshrl.u32 %v61_v13, 5 }
  0x28   :  { %v64_v17 = vsub.s32 32, %v63_v14  ;;  %v66_v19 = vshll.u32 %v252_v18, %v63_v14  ;;  %v69_v21 = vshll.u32 %v253_v20, %v63_v14  ;;  %v72_v23 = vshll.u32 %v254_v22, %v63_v14 }
  0x29   :  { %v75_v25 = vshll.u32 %v255_v24, %v63_v14  ;;  %v78_v27 = vshll.u32 %v256_v26, %v63_v14  ;;  %vm81_vm1 = vcmp.lt.s32.totalorder %v62_v16, 1  ;;  %vm84_vm2 = vcmp.lt.s32.totalorder %v62_v16, 4 }
  0x2a   :  { %v65_v28 = vshrl.u32 %v252_v18, %v64_v17  ;;  %v67_v29 = vshrl.u32 %v253_v20, %v64_v17  ;;  %v70_v30 = vshrl.u32 %v254_v22, %v64_v17  ;;  %v73_v31 = vshrl.u32 %v255_v24, %v64_v17 }
  0x2b   :  { %v76_v32 = vshrl.u32 %v256_v26, %v64_v17  ;;  %v79_v34 = vshrl.u32 %v257_v33, %v64_v17  ;;  %vm82_vm3 = vcmp.lt.s32.totalorder %v62_v16, 2  ;;  %vm83_vm4 = vcmp.lt.s32.totalorder %v62_v16, 3  ;;  %v153_v33 = vld [vmem:[#allocation2] sm:$0xff] }
  0x2c   :  { %v68_v36 = vor.u32 %v67_v29, %v66_v19  ;;  %v71_v37 = vor.u32 %v70_v30, %v69_v21  ;;  %v74_v38 = vor.u32 %v73_v31, %v72_v23 }
  0x2d   :  { %v77_v39 = vor.u32 %v76_v32, %v75_v25  ;;  %v80_v40 = vor.u32 %v79_v34, %v78_v27 }
  0x2e   :  { %v85_v41 = vsel %vm81_vm1, %v65_v28, %v68_v36  ;;  %v86_v42 = vsel %vm84_vm2, %v74_v38, 2102212464  ;;  %v89_v43 = vsel %vm81_vm1, %v68_v36, %v71_v37  ;;  %v93_v44 = vsel %vm81_vm1, %v71_v37, %v74_v38 }
  0x2f   :  { %v87_v45 = vsel %vm83_vm4, %v71_v37, %v86_v42  ;;  %v90_v46 = vsel %vm84_vm2, %v77_v39, 920167782  ;;  %v94_v47 = vsel %vm84_vm2, %v80_v40, 1326507024 }
  0x30   :  { %v91_v48 = vsel %vm83_vm4, %v74_v38, %v90_v46  ;;  %v95_v49 = vsel %vm83_vm4, %v77_v39, %v94_v47  ;;  %v88_v50 = vsel %vm82_vm3, %v85_v41, %v87_v45 }
  0x31   :  { %v92_v51 = vsel %vm82_vm3, %v89_v43, %v91_v48  ;;  %v96_v52 = vsel %vm82_vm3, %v93_v44, %v95_v49  ;;  %v104_v57 = vmul.u32 %v97_v35, %v88_v50 }
  0x32   :  { %v304_v53 = vmul.u32.u64.low %v97_v35, %v96_v52  ;;  %v305_v54 = vmul.u32.u64.high %v97_v35, %v96_v52, %v304_v53  ;;  %v307_v55 = vmul.u32.u64.low %v97_v35, %v92_v51  ;;  %v308_v56 = vmul.u32.u64.high %v97_v35, %v92_v51, %v307_v55 }
  0x34   :  { %vm106_vm5 = vc.u32 %v305_v54, %v307_v55  ;;  %v107_v58 = vadd.s32 1, %v308_v56  ;;  %v105_v5 = vadd.s32 %v307_v55, %v305_v54 }
  0x36   :  { %v108_v59 = vsel %vm106_vm5, %v107_v58, %v308_v56 }
  0x37   :  { %v109_v60 = vadd.s32 %v108_v59, %v104_v57 }
  0x39   :  { %v110_v61 = vadd.s32 536870912, %v109_v60 }
  0x3b   :  { %v111_v62 = vshrl.u32 %v110_v61, 30 }
  0x3d   :  { %v112_v63 = vshll.u32 %v111_v62, 30  ;;  %v135_v19 = vsub.s32 4, %v111_v62 }
  0x3f   :  { %v113_v0 = vsub.s32 %v109_v60, %v112_v63  ;;  %v136_v22 = vsel %vm51_vm7, %v135_v19, %v111_v62 }
  0x40   :  { %v138_v25 = vsel %vm50_vm8, 0, %v136_v22 }
  0x41   :  { %v115_v1 = vsub.s32 0, %v113_v0  ;;  %v142_v26 = vadd.s32 3, %v138_v25 }
  0x43   :  { %v183_v2 = vmin.u32 %v115_v1, %v113_v0  ;;  %v143_v27 = vand.u32 3, %v142_v26 }
  0x45   :  { %v117_v3 = vclz %v183_v2  ;;  %vm148_vm9 = vcmp.eq.s32.totalorder %v143_v27, 2  ;;  %vm145_vm10 = vcmp.eq.s32.totalorder %v143_v27, 0  ;;  %vm144_vm11 = vcmp.lt.s32.totalorder %v143_v27, 2 }
  0x47   :  { %v184_v4 = vadd.s32 4294967294, %v117_v3 }
  0x49   :  { %vm185_vm6 = vcmp.lt.s32.totalorder %v184_v4, 0 }
  0x4a   :  { %v120_v7 = vsel %vm185_vm6, 0, %v184_v4 }
  0x4b   :  { %v121_v8 = vsub.s32 32, %v120_v7  ;;  %v122_v10 = vshll.u32 %v113_v0, %v120_v7  ;;  %v125_v11 = vsub.s32 4294967266, %v120_v7 }
  0x4d   :  { %v123_v12 = vshrl.u32 %v105_v5, %v121_v8  ;;  %v126_v13 = vadd.s32 127, %v125_v11 }
  0x4f   :  { %v124_v14 = vor.u32 %v123_v12, %v122_v10  ;;  %v127_v15 = vshll.u32 %v126_v13, 23 }
  0x51   :  { %v128_v16 = vor.u32 4788187, %v127_v15  ;;  %v131_v17 = vcvt.s32.f32 %v124_v14 }
  0x53   :  { %v129_v18 = vand.u32 2147483647, %v128_v16 }
  0x55   :  { %v132_v20 = vmul.f32 %v131_v17, %v129_v18 }
  0x57   :  { %v133_v21 = vxor.u32 2147483648, %v132_v20 }
  0x59   :  { %v134_v23 = vsel %vm51_vm7, %v133_v21, %v132_v20 }
  0x5a   :  { %v137_v24 = vsel %vm50_vm8, %v298_v6, %v134_v23 }
  0x5b   :  { %199 = vcosq.f32 %v137_v24 }
  0x5c   :  { %201 = vsinq.f32 %v137_v24 }
  0x65   :  { %v200_v28 = vpop.eup %199 }
  0x66   :  { %v202_v29 = vpop.eup %201  ;;  %v149_v30 = vxor.u32 2147483648, %v200_v28 }
  0x67   :  { %v146_v31 = vxor.u32 2147483648, %v202_v29 }
  0x68   :  { %v150_v9 = vsel %vm148_vm9, %v149_v30, %v202_v29 }
  0x69   :  { %v147_v32 = vsel %vm145_vm10, %v200_v28, %v146_v31 }
  0x6a   :  { %v151_v34 = vsel %vm144_vm11, %v147_v32, %v150_v9 }
  0x6b   :  { %v152_v35 = vsel %vm141_vm12, nan, %v151_v34 }
  0x6c   :  { %v154_v36 = vadd.f32 %v153_v33, %v152_v35  ;;  %159 = vrot.lane.b32.xlu0 %v152_v35, %s258_s0 }
  0x6e   :  { %156 = vst.msk [vmem:[#allocation5] sm:$0xff] %vm155_vm13, %v154_v36 }
  0xde   :  { %v160_v37 = vpop.permute.xlu0 %159 }
  0xdf   :  { %v162_v38 = vadd.f32 %v160_v37, %v153_v33 }
  0xe1   :  { %164 = vst.msk [vmem:[#allocation5] sm:$0xff] %vm163_vm14, %v162_v38 }
  0xe2   :  { %236 = shalt.err (!%p233_p12)
}
  0xe3   :  { %s237_s4 = scalar_lea.hbm %s334_s3, 128 }
  0xe4   :  { %p238_p13 = scmp.ne.s32.totalorder %s334_s3, %s237_s4  ;;  %p241_p0 = scmp.lt.u32.totalorder %s237_s4, %s334_s3 }
  0xe6   :  { %p243_p1 = pnand %p241_p0, %p238_p13 }
  0xe8   :  { %246 = shalt.err (!%p243_p1)
}
  0xe9   :  { %174 = dma.vmem_to_hbm [thread:$0]  %s172_s2, 128, %s334_s3, [#allocation4]  }
  0xea   :  { %249 = dma.done.wait [#allocation4], 128  }
  0xeb   :  { %250 = vsyncadd [#allocation4], 4294967168 }
  0xec   :  { %178 = vsyncpa [#allocation3], 1 }
  0xed   :  { %179 = vsyncpa [#allocation4], 1 }

</bundles_post_ra>
